<compile_context>
chip_gen: v7x
topology: tpu7x:2x2x1
jax: 0.10.0
libtpu: 0.0.40
codegen_flags: <defaults>
</compile_context>

<pallas_src>
import functools

import jax
import jax.numpy as jnp
from jax import lax
from jax.experimental import pallas as pl
from jax.experimental.pallas import tpu as pltpu

_LANE = 128
_NEG_INF = -1e30


def _round_up(x, m):
    return ((x + m - 1) // m) * m


def _fused_sage_kernel(a_ref, h0_ref, ws_ref, wn_ref, b_ref, o_ref, h_scr,
                       *, n_classes):
    """One grid step == one SAGEConv layer. H is resident in VMEM scratch."""
    layer = pl.program_id(0)
    n_layers = pl.num_programs(0)

    # Load the (padded) input features into the resident hidden-state buffer once.
    @pl.when(layer == 0)
    def _():
        h_scr[...] = h0_ref[...]

    h = h_scr[...]                       # (Np, Fp) bf16
    ws = ws_ref[0]                       # (Fp, Fp) bf16
    wn = wn_ref[0]                       # (Fp, Fp) bf16
    b = b_ref[0]                         # (1, Fp)  f32  (broadcast over rows)

    # Self path:  H @ W_self                                   (f32 accumulation)
    self_path = jnp.dot(h, ws, preferred_element_type=jnp.float32)
    # Neighbor path, re-associated:  A @ (H @ W_neigh)
    neigh_proj = jnp.dot(h, wn, preferred_element_type=jnp.float32)
    neigh_path = jnp.dot(a_ref[...], neigh_proj.astype(jnp.bfloat16),
                         preferred_element_type=jnp.float32)

    out = self_path + neigh_path + b     # f32 epilogue

    # Hidden layers: ReLU, keep H resident (bf16) for the next grid step.
    @pl.when(layer < n_layers - 1)
    def _():
        h_scr[...] = jnp.maximum(out, 0.0).astype(h_scr.dtype)

    # Last layer: masked, numerically-stable log_softmax over the real class lanes.
    @pl.when(layer == n_layers - 1)
    def _():
        col = lax.broadcasted_iota(jnp.int32, out.shape, 1)
        z = jnp.where(col < n_classes, out, _NEG_INF)      # mask padded class lanes
        m = jnp.max(z, axis=1, keepdims=True)
        z = z - m
        lse = jnp.log(jnp.sum(jnp.exp(z), axis=1, keepdims=True))
        o_ref[...] = (z - lse).astype(o_ref.dtype)


def graphsage_forward(a_norm, features, params, n_classes):
    """params: list of (w_self, w_neigh, bias) with f32 weights.

    a_norm: (N, N) row-normalized dense adjacency (mean aggregator).
    Returns (N, n_classes) log-probabilities, matching GraphSAGE_model.forward.
    """
    n, f_in = features.shape
    n_l = len(params)
    dims = [f_in] + [w.shape[1] for (w, _, _) in params]
    fp = _round_up(max(max(dims), n_classes), _LANE)   # lane-dense padded feature dim
    np_ = _round_up(n, _LANE)                          # padded node count

    # Pad once on the host side (zero padding is exact for mean aggregation:
    # padded rows/cols of A and padded feature lanes contribute nothing).
    a_p = jnp.zeros((np_, np_), jnp.bfloat16).at[:n, :n].set(a_norm.astype(jnp.bfloat16))
    h0_p = jnp.zeros((np_, fp), jnp.bfloat16).at[:n, :f_in].set(features.astype(jnp.bfloat16))

    ws_stack = jnp.zeros((n_l, fp, fp), jnp.bfloat16)
    wn_stack = jnp.zeros((n_l, fp, fp), jnp.bfloat16)
    b_stack = jnp.zeros((n_l, 1, fp), jnp.float32)
    for i, (ws, wn, b) in enumerate(params):
        fi, fo = ws.shape
        ws_stack = ws_stack.at[i, :fi, :fo].set(ws.astype(jnp.bfloat16))
        wn_stack = wn_stack.at[i, :fi, :fo].set(wn.astype(jnp.bfloat16))
        b_stack = b_stack.at[i, 0, :fo].set(b.reshape(-1).astype(jnp.float32))

    vmem = pltpu.MemorySpace.VMEM
    out_p = pl.pallas_call(
        functools.partial(_fused_sage_kernel, n_classes=n_classes),
        out_shape=jax.ShapeDtypeStruct((np_, fp), jnp.float32),
        grid_spec=pltpu.PrefetchScalarGridSpec(
            num_scalar_prefetch=0,
            grid=(n_l,),   # one grid step per SAGEConv layer
            in_specs=[
                # A: constant block index -> DMAed once, stays resident in VMEM.
                pl.BlockSpec((np_, np_), lambda l: (0, 0), memory_space=vmem),
                pl.BlockSpec((np_, fp), lambda l: (0, 0), memory_space=vmem),
                # Per-layer weights / bias streamed (and prefetched) by layer index.
                pl.BlockSpec((1, fp, fp), lambda l: (l, 0, 0), memory_space=vmem),
                pl.BlockSpec((1, fp, fp), lambda l: (l, 0, 0), memory_space=vmem),
                pl.BlockSpec((1, 1, fp), lambda l: (l, 0, 0), memory_space=vmem),
            ],
            out_specs=pl.BlockSpec((np_, fp), lambda l: (0, 0), memory_space=vmem),
            scratch_shapes=[pltpu.VMEM((np_, fp), jnp.bfloat16)],  # resident H
        ),
        compiler_params=pltpu.CompilerParams(
            dimension_semantics=("arbitrary",),       # layers are sequential
            vmem_limit_bytes=32 * 1024 * 1024,
        ),
    )(a_p, h0_p, ws_stack, wn_stack, b_stack)

    return out_p[:n, :n_classes]


def init_params(key, dims):
    """Deterministic Linear-default init for each SAGEConv layer (f32 masters)."""
    params = []
    keys = jax.random.split(key, 3 * (len(dims) - 1))
    for i in range(len(dims) - 1):
        f_in, f_out = dims[i], dims[i + 1]
        lim = 1.0 / float(f_in) ** 0.5
        ws = jax.random.uniform(keys[3 * i + 0], (f_in, f_out),
                                minval=-lim, maxval=lim, dtype=jnp.float32)
        wn = jax.random.uniform(keys[3 * i + 1], (f_in, f_out),
                                minval=-lim, maxval=lim, dtype=jnp.float32)
        b = jax.random.uniform(keys[3 * i + 2], (1, f_out),
                               minval=-lim, maxval=lim, dtype=jnp.float32)
        params.append((ws, wn, b))
    return params


def _reference(a_norm, features, params):
    """Pure-JAX f32 reference (same math as the PyTorch module)."""
    h = features
    n_l = len(params)
    for i, (ws, wn, b) in enumerate(params):
        out = h @ ws + (a_norm @ h) @ wn + b
        h = jnp.maximum(out, 0.0) if i < n_l - 1 else jax.nn.log_softmax(out, axis=1)
    return h


if __name__ == "__main__":
    key = jax.random.PRNGKey(0)
    k_adj, k_feat, k_par = jax.random.split(key, 3)

    # Small, module-consistent shapes
    N = 16          # number of graph nodes
    in_feats = 8
    n_hidden = 32
    n_classes = 4
    n_layers = 2    # -> n_layers + 1 = 3 SAGEConv layers total

    # Random graph with self-loops (nonzero degree), row-normalized for "mean" aggr.
    adj = (jax.random.uniform(k_adj, (N, N)) < 0.3).astype(jnp.float32)
    adj = adj.at[jnp.arange(N), jnp.arange(N)].set(1.0)
    deg = jnp.maximum(jnp.sum(adj, axis=1, keepdims=True), 1.0)
    a_norm = adj / deg                                   # (N, N)

    features = jax.random.normal(k_feat, (N, in_feats), dtype=jnp.float32)

    dims = [in_feats] + [n_hidden] * n_layers + [n_classes]
    params = init_params(k_par, dims)

    # TODO(synk): feat_drop (dropout) is a no-op here (inference semantics).
    out = graphsage_forward(a_norm, features, params, n_classes)
    out = jax.block_until_ready(out)
    assert out.shape == (N, n_classes)
    assert bool(jnp.all(jnp.isfinite(out)))

    ref = _reference(a_norm, features, params)
    max_err = float(jnp.max(jnp.abs(out - ref)))
    assert jnp.allclose(out, ref, atol=0.25, rtol=0.05), f"max abs err {max_err}"
    print("KERNEL_OK")
</pallas_src>

<mosaic_0001>
module attributes {stable_mosaic.version = 11 : i64} {
  func.func @_fused_sage_kernel(%arg0: i32, %arg1: memref<128x128xbf16, #tpu.memory_space<vmem>>, %arg2: memref<128x128xbf16, #tpu.memory_space<vmem>>, %arg3: memref<1x128x128xbf16, #tpu.memory_space<vmem>>, %arg4: memref<1x128x128xbf16, #tpu.memory_space<vmem>>, %arg5: memref<1x1x128xf32, #tpu.memory_space<vmem>>, %arg6: memref<128x128xf32, #tpu.memory_space<vmem>>, %arg7: memref<128x128xbf16, #tpu.memory_space<vmem>>) attributes {dimension_semantics = [#tpu.dimension_semantics<arbitrary>], iteration_bounds = array<i64: 3>, scalar_prefetch = 0 : i64, scratch_operands = 1 : i64, tpu.core_type = #tpu.core_type<tc>, window_params = [{pipeline_mode = #tpu.pipeline_mode<synchronous>, transform_indices = @transform_0, window_bounds = array<i64: 128, 128>}, {pipeline_mode = #tpu.pipeline_mode<synchronous>, transform_indices = @transform_1, window_bounds = array<i64: 128, 128>}, {transform_indices = @transform_2, window_bounds = array<i64: 1, 128, 128>}, {transform_indices = @transform_3, window_bounds = array<i64: 1, 128, 128>}, {transform_indices = @transform_4, window_bounds = array<i64: 1, 1, 128>}, {pipeline_mode = #tpu.pipeline_mode<synchronous>, transform_indices = @transform_5, window_bounds = array<i64: 128, 128>}]} {
    %c0_i32 = arith.constant 0 : i32
    %0 = arith.cmpi eq, %arg0, %c0_i32 : i32
    %1 = arith.extui %0 : i1 to i32
    %c0_i32_0 = arith.constant 0 : i32
    %2 = arith.cmpi ne, %1, %c0_i32_0 : i32
    scf.if %2 {
      %c0_18 = arith.constant 0 : index
      %c0_19 = arith.constant 0 : index
      %24 = vector.load %arg2[%c0_18, %c0_19] : memref<128x128xbf16, #tpu.memory_space<vmem>>, vector<128x128xbf16>
      %c0_20 = arith.constant 0 : index
      %c0_21 = arith.constant 0 : index
      %25 = vector.load %arg7[%c0_20, %c0_21] : memref<128x128xbf16, #tpu.memory_space<vmem>>, vector<128x128xbf16>
      tpu.vector_store %arg7[%c0_20, %c0_21], %24 {strides = array<i32>} : memref<128x128xbf16, #tpu.memory_space<vmem>>, vector<128x128xbf16>,
    } else {
    }
    %c0 = arith.constant 0 : index
    %c0_1 = arith.constant 0 : index
    %3 = vector.load %arg7[%c0, %c0_1] : memref<128x128xbf16, #tpu.memory_space<vmem>>, vector<128x128xbf16>
    %c0_2 = arith.constant 0 : index
    %c0_3 = arith.constant 0 : index
    %c0_4 = arith.constant 0 : index
    %4 = vector.load %arg3[%c0_2, %c0_3, %c0_4] : memref<1x128x128xbf16, #tpu.memory_space<vmem>>, vector<1x128x128xbf16>
    %5 = vector.shape_cast %4 : vector<1x128x128xbf16> to vector<128x128xbf16>
    %c0_5 = arith.constant 0 : index
    %c0_6 = arith.constant 0 : index
    %c0_7 = arith.constant 0 : index
    %6 = vector.load %arg4[%c0_5, %c0_6, %c0_7] : memref<1x128x128xbf16, #tpu.memory_space<vmem>>, vector<1x128x128xbf16>
    %7 = vector.shape_cast %6 : vector<1x128x128xbf16> to vector<128x128xbf16>
    %c0_8 = arith.constant 0 : index
    %c0_9 = arith.constant 0 : index
    %c0_10 = arith.constant 0 : index
    %8 = vector.load %arg5[%c0_8, %c0_9, %c0_10] : memref<1x1x128xf32, #tpu.memory_space<vmem>>, vector<1x1x128xf32>
    %9 = vector.shape_cast %8 : vector<1x1x128xf32> to vector<1x128xf32>
    %cst = arith.constant dense<0.000000e+00> : vector<128x128xf32>
    %10 = tpu.matmul %3, %5, %cst {dimension_numbers = #tpu.dot_dimension_numbers<[1], [0], [0], [1], [0, 0, 1, 1], [], []>} : vector<128x128xbf16>, vector<128x128xbf16>, vector<128x128xf32> -> vector<128x128xf32>
    %cst_11 = arith.constant dense<0.000000e+00> : vector<128x128xf32>
    %11 = tpu.matmul %3, %7, %cst_11 {dimension_numbers = #tpu.dot_dimension_numbers<[1], [0], [0], [1], [0, 0, 1, 1], [], []>} : vector<128x128xbf16>, vector<128x128xbf16>, vector<128x128xf32> -> vector<128x128xf32>
    %c0_12 = arith.constant 0 : index
    %c0_13 = arith.constant 0 : index
    %12 = vector.load %arg1[%c0_12, %c0_13] : memref<128x128xbf16, #tpu.memory_space<vmem>>, vector<128x128xbf16>
    %13 = arith.truncf %11 : vector<128x128xf32> to vector<128x128xbf16>
    %cst_14 = arith.constant dense<0.000000e+00> : vector<128x128xf32>
    %14 = tpu.matmul %12, %13, %cst_14 {dimension_numbers = #tpu.dot_dimension_numbers<[1], [0], [0], [1], [0, 0, 1, 1], [], []>} : vector<128x128xbf16>, vector<128x128xbf16>, vector<128x128xf32> -> vector<128x128xf32>
    %15 = arith.addf %10, %14 : vector<128x128xf32>
    %16 = vector.broadcast %9 : vector<1x128xf32> to vector<128x128xf32>
    %17 = arith.addf %15, %16 : vector<128x128xf32>
    %c2_i32 = arith.constant 2 : i32
    %18 = arith.cmpi slt, %arg0, %c2_i32 : i32
    %19 = arith.extui %18 : i1 to i32
    %c0_i32_15 = arith.constant 0 : i32
    %20 = arith.cmpi ne, %19, %c0_i32_15 : i32
    scf.if %20 {
      %cst_18 = arith.constant 0.000000e+00 : f32
      %24 = vector.broadcast %cst_18 : f32 to vector<128x128xf32>
      %25 = arith.maximumf %17, %24 : vector<128x128xf32>
      %26 = arith.truncf %25 : vector<128x128xf32> to vector<128x128xbf16>
      %c0_19 = arith.constant 0 : index
      %c0_20 = arith.constant 0 : index
      %27 = vector.load %arg7[%c0_19, %c0_20] : memref<128x128xbf16, #tpu.memory_space<vmem>>, vector<128x128xbf16>
      tpu.vector_store %arg7[%c0_19, %c0_20], %26 {strides = array<i32>} : memref<128x128xbf16, #tpu.memory_space<vmem>>, vector<128x128xbf16>,
    } else {
    }
    %c2_i32_16 = arith.constant 2 : i32
    %21 = arith.cmpi eq, %arg0, %c2_i32_16 : i32
    %22 = arith.extui %21 : i1 to i32
    %c0_i32_17 = arith.constant 0 : i32
    %23 = arith.cmpi ne, %22, %c0_i32_17 : i32
    scf.if %23 {
      %24 = tpu.iota {dimensions = array<i32: 1>} : vector<128x128xi32>
      %c4_i32 = arith.constant 4 : i32
      %25 = vector.broadcast %c4_i32 : i32 to vector<128x128xi32>
      %26 = arith.cmpi slt, %24, %25 : vector<128x128xi32>
      %cst_18 = arith.constant -1.000000e+30 : f32
      %27 = vector.broadcast %cst_18 : f32 to vector<128x128xf32>
      %28 = arith.select %26, %17, %27 : vector<128x128xi1>, vector<128x128xf32>
      %cst_19 = arith.constant dense<0xFF800000> : vector<128xf32>
      %29 = vector.multi_reduction <maximumf>, %28, %cst_19 [1] : vector<128x128xf32> to vector<128xf32>
      %30 = vector.shape_cast %29 : vector<128xf32> to vector<128x1xf32>
      %31 = vector.broadcast %30 : vector<128x1xf32> to vector<128x128xf32>
      %32 = arith.subf %28, %31 : vector<128x128xf32>
      %33 = math.exp %32 : vector<128x128xf32>
      %cst_20 = arith.constant dense<0.000000e+00> : vector<128xf32>
      %34 = vector.multi_reduction <add>, %33, %cst_20 [1] : vector<128x128xf32> to vector<128xf32>
      %35 = vector.shape_cast %34 : vector<128xf32> to vector<128x1xf32>
      %36 = math.log %35 : vector<128x1xf32>
      %37 = vector.broadcast %36 : vector<128x1xf32> to vector<128x128xf32>
      %38 = arith.subf %32, %37 : vector<128x128xf32>
      %c0_21 = arith.constant 0 : index
      %c0_22 = arith.constant 0 : index
      %39 = vector.load %arg6[%c0_21, %c0_22] : memref<128x128xf32, #tpu.memory_space<vmem>>, vector<128x128xf32>
      tpu.vector_store %arg6[%c0_21, %c0_22], %38 {strides = array<i32>} : memref<128x128xf32, #tpu.memory_space<vmem>>, vector<128x128xf32>,
    } else {
    }
    return
  }
  func.func @transform_0(%arg0: i32) -> (i32, i32) {
    %c0_i32 = arith.constant 0 : i32
    %c0_i32_0 = arith.constant 0 : i32
    %c0_i32_1 = arith.constant 0 : i32
    return %c0_i32, %c0_i32_0 : i32, i32
  }
  func.func @transform_1(%arg0: i32) -> (i32, i32) {
    %c0_i32 = arith.constant 0 : i32
    %c0_i32_0 = arith.constant 0 : i32
    %c0_i32_1 = arith.constant 0 : i32
    return %c0_i32, %c0_i32_0 : i32, i32
  }
  func.func @transform_2(%arg0: i32) -> (i32, i32, i32) {
    %c0_i32 = arith.constant 0 : i32
    %c0_i32_0 = arith.constant 0 : i32
    %c0_i32_1 = arith.constant 0 : i32
    return %arg0, %c0_i32, %c0_i32_0 : i32, i32, i32
  }
  func.func @transform_3(%arg0: i32) -> (i32, i32, i32) {
    %c0_i32 = arith.constant 0 : i32
    %c0_i32_0 = arith.constant 0 : i32
    %c0_i32_1 = arith.constant 0 : i32
    return %arg0, %c0_i32, %c0_i32_0 : i32, i32, i32
  }
  func.func @transform_4(%arg0: i32) -> (i32, i32, i32) {
    %c0_i32 = arith.constant 0 : i32
    %c0_i32_0 = arith.constant 0 : i32
    %c0_i32_1 = arith.constant 0 : i32
    return %arg0, %c0_i32, %c0_i32_0 : i32, i32, i32
  }
  func.func @transform_5(%arg0: i32) -> (i32, i32) {
    %c0_i32 = arith.constant 0 : i32
    %c0_i32_0 = arith.constant 0 : i32
    %c0_i32_1 = arith.constant 0 : i32
    return %c0_i32, %c0_i32_0 : i32, i32
  }
}

</mosaic_0001>

<bundles_post_ra>
// kernel: tpu_custom_call.1
= control target key start
LH: loop header
LB: loop body
LE: loop exit
PB: predicated region body
PF: predicated region fallthrough
CT: control target
= control target key end

     0   :  { %10 = vsyncpa [#allocation4], 0  ;;  %s2401_s0 = inlined_call_operand.hbm [shape: bf16[128,128], index: 0, kind: input, shape index: {}]   ;;  %s2402_s1 = inlined_call_operand.hbm [shape: bf16[128,128], index: 1, kind: input, shape index: {}]   ;;  %s2403_s2 = inlined_call_operand.hbm [shape: bf16[3,128,128], index: 2, kind: input, shape index: {}]   ;;  %s2404_s3 = inlined_call_operand.hbm [shape: bf16[3,128,128], index: 3, kind: input, shape index: {}]   ;;  %s2405_s4 = inlined_call_operand.vmem [shape: f32[3,1,128], index: 4, kind: input, shape index: {}]   ;;  %s2406_s5 = inlined_call_operand.hbm [shape: f32[128,128], index: 5, kind: output, shape index: {}]  }
   0x1   :  { %11 = vsyncpa [#allocation7], 0 }
   0x2   :  { %12 = vsyncpa [#allocation5], 0  ;;  %s1885_s18 = smov 0   ;;  %s1887_s19 = smov 0  }
   0x3   :  { %s1889_s20 = smov 0   ;;  %s1891_s21 = smov 0  }
   0x4 LB: > { %s1904_s22 = sadd.s32 4294967295, %s1844_s21   ;;  %s1907_s23 = sadd.s32 1, %s1844_s21   ;;  %s1844_s21 = sphi %s1891_s21, %s2437_s21   ;;  %s1840_s20 = sphi %s1889_s20, %s2436_s20   ;;  %s1836_s19 = sphi %s1887_s19, %s2435_s19   ;;  %s1832_s18 = sphi %s1885_s18, %s2434_s18  }
   0x5   : > { %s64_s24 = ssub.s32 %s1844_s21, %s1907_s23  ;;  %s67_s25 = sadd.s32 1, %s1840_s20 }
   0x6   : > { %p65_p0 = scmp.eq.s32.totalorder %s64_s24, 0  ;;  %p74_p1 = scmp.ne.s32.totalorder %s1840_s20, %s1836_s19 }
   0x7   : > { %p75_p2 = scmp.eq.s32.totalorder %s1844_s21, 0  ;;  %p80_p3 = scmp.ne.s32.totalorder %s1836_s19, %s1832_s18 }
   0x8   : > { %s1917_s26 = scalar_select %p65_p0, %s1840_s20, %s67_s25  }
   0x9   : > { %p1919_p4 = por %p75_p2, %p74_p1  ;;  %p2407_p5 = scmp.eq.s32.totalorder %s1904_s22, 0 }
   0xa   : > { %p1251_p6 = scmp.ge.s32.totalorder %s1844_s21, 1  ;;  %p164_p7 = scmp.lt.s32.totalorder %s1844_s21, 4 }
   0xb   : > { %p1928_p8 = por %p2407_p5, %p80_p3  ;;  %s1846_s30 = smov [#allocation3]  }
   0xc   : > { %p1933_p10 = pnand %p1251_p6, %p164_p7  ;;  %s176_s6 = sshll.u32 %s1846_s30, 4  ;;  %s177_s6 = int_to_ptr.vmem [resolvable:$true] %s176_s6 }
   0xd   : > { %s2416_s28 = scalar_select %p1928_p8, 1, 0 }
   0xe   : > { %s2417_s29 = scalar_select %p1933_p10, 1, 0 }
   0xf   : > { %p1500_p11 = pneg %p1933_p10  ;;  %p1516_p13 = scmp.lt.s32.totalorder %s1844_s21, 3 }
  0x10   : > { %s203_s8 = sand.u32 1, %s1844_s21   ;;  %s205_s9 = sand.u32 1, %s1840_s20  }
  0x11   : > { %p1941_p12 = pnand %p1500_p11, %p2407_p5  ;;  %p1950_p0 = pnand %p1516_p13, %p1919_p4 }
  0x12   : > { %s1656_s13 = scalar_lea.hbm %s2401_s0, 1024 }
  0x13   : > { %s2419_s10 = scalar_select %p1950_p0, 1, 0 }
  0x14   : > { %p1657_p1 = scmp.ne.s32.totalorder %s2401_s0, %s1656_s13  ;;  %p2412_p2 = pneg %p1941_p12 }
  0x15   : > { %p1663_p4 = scmp.lt.u32.totalorder %s1656_s13, %s2401_s0 }
  0x16   : > { %p1659_p3 = pnand %p2412_p2, %p1657_p1 }
  0x18   : > { %p1660_p6 = pneg %p1659_p3 }
  0x1a   : > { %p1665_p7 = pnand %p1663_p4, %p1660_p6 }
  0x1c   : > { %1668 = shalt.err (!%p1665_p7)
}
  0x1d   : > { %s1669_s18 = scalar_lea.vmem %s177_s6, 1024  ;;  %p1677_p5 = scmp.lt.s32.totalorder %s177_s6, %s177_s6 }
  0x1e   : > { %p1670_p11 = scmp.ne.s32.totalorder %s177_s6, %s1669_s18  ;;  %p1678_p8 = scmp.lt.s32.totalorder %s1669_s18, %s1669_s18 }
  0x20   : > { %p1672_p13 = pnand %p1670_p11, %p2412_p2  ;;  %p1679_p10 = por %p1678_p8, %p1677_p5 }
  0x22   : > { %p1673_p9 = pneg %p1672_p13 }
  0x24   : > { %p1680_p0 = pnand %p1679_p10, %p1673_p9 }
  0x26   : > { %1683 = shalt.err (!%p1680_p0)
}
  0x27   : > { %s1847_s24 = smov 64   ;;  %s1848_s25 = smov 4  }
  0x28   : > { %1503 = dma.hbm_to_vmem [thread:$0]  (!%p1941_p12), %s2401_s0, 1024, %s177_s6, [#allocation4], %s1847_s24, %s1847_s24, %s1848_s25  }
  0x29   : > { %s1979_s11 = sshll.u32 %s205_s9, 6  ;;  %s2411_s12 = sshll.u32 %s1844_s21, 10 }
  0x2a   : > { %s1987_s15 = scalar_lea.hbm %s2403_s2, %s2411_s12  ;;  %s207_s16 = scalar_lea.vmem [#allocation8], %s1979_s11 }
  0x2b   : > { %s214_s17 = sshll.u32 %s207_s16, 4  ;;  %s1849_s18 = smov [#allocation6]   ;;  %s1990_s17 = int_to_ptr.vmem [resolvable:$true] %s214_s17 }
  0x2c   : > { %s1992_s6 = sshll.u32 %s1849_s18, 4  ;;  %s1996_s9 = scalar_lea.sflag [#allocation4], %s203_s8  ;;  %s190_s6 = int_to_ptr.vmem [resolvable:$true] %s1992_s6 }
  0x2d   : > { %s1684_s27 = scalar_lea.hbm %s1987_s15, 1024  ;;  %p2420_p8 = scmp.ne.s32.totalorder %s2419_s10, 0 }
  0x2e   : > { %p1685_p5 = scmp.ne.s32.totalorder %s1987_s15, %s1684_s27  ;;  %s1689_s14 = scalar_lea.hbm %s2403_s2, 3072 }
  0x2f   : > { %p2413_p9 = pneg %p2420_p8  ;;  %p1690_p1 = scmp.lt.u32.totalorder %s1987_s15, %s2403_s2 }
  0x30   : > { %p1691_p3 = scmp.lt.u32.totalorder %s1689_s14, %s1684_s27  ;;  %p1693_p4 = scmp.lt.u32.totalorder %s1684_s27, %s1987_s15 }
  0x31   : > { %p1687_p10 = pnand %p2413_p9, %p1685_p5 }
  0x32   : > { %p1692_p6 = por %p1691_p3, %p1690_p1 }
  0x33   : > { %p1688_p0 = pneg %p1687_p10 }
  0x34   : > { %p1694_p7 = por %p1693_p4, %p1692_p6 }
  0x36   : > { %p1695_p11 = pnand %p1694_p7, %p1688_p0 }
  0x38   : > { %1698 = shalt.err (!%p1695_p11)
}
  0x39   : > { %s1699_s8 = scalar_lea.vmem %s1990_s17, 1024  ;;  %s1850_s18 = smov [#allocation8]  }
  0x3a   : > { %p1700_p13 = scmp.ne.s32.totalorder %s1990_s17, %s1699_s8  ;;  %s1704_s30 = sshll.u32 %s1850_s18, 4  ;;  %s1705_s30 = int_to_ptr.vmem [resolvable:$false] %s1704_s30 }
  0x3b   : > { %s1706_s12 = scalar_lea.vmem %s1705_s30, 2048  ;;  %p1707_p2 = scmp.lt.s32.totalorder %s1990_s17, %s1705_s30 }
  0x3c   : > { %p1702_p5 = pnand %p1700_p13, %p2413_p9  ;;  %p1708_p1 = scmp.lt.s32.totalorder %s1706_s12, %s1699_s8 }
  0x3e   : > { %p1703_p10 = pneg %p1702_p5  ;;  %p1709_p3 = por %p1708_p1, %p1707_p2 }
  0x40   : > { %p1710_p6 = pnand %p1709_p3, %p1703_p10 }
  0x42   : > { %1713 = shalt.err (!%p1710_p6)
}
  0x43   : > { %1510 = dma.hbm_to_vmem [thread:$0]  (!%p2420_p8), %s1987_s15, 1024, %s1990_s17, %s1996_s9, %s1847_s24, %s1847_s24, %s1848_s25  }
  0x44   : > { %s1714_s14 = scalar_lea.hbm %s2402_s1, 1024  ;;  %p2421_p0 = pneg %p1941_p12 }
  0x45   : > { %p1715_p2 = scmp.ne.s32.totalorder %s2402_s1, %s1714_s14  ;;  %p1721_p11 = scmp.lt.u32.totalorder %s1714_s14, %s2402_s1 }
  0x47   : > { %p1717_p4 = pnand %p1715_p2, %p2421_p0 }
  0x49   : > { %p1718_p7 = pneg %p1717_p4 }
  0x4b   : > { %p1723_p13 = pnand %p1721_p11, %p1718_p7 }
  0x4d   : > { %1726 = shalt.err (!%p1723_p13)
}
  0x4e   : > { %s1727_s15 = scalar_lea.vmem %s190_s6, 1024  ;;  %p2422_p10 = pmov %p2421_p0 }
  0x4f   : > { %p1728_p5 = scmp.ne.s32.totalorder %s190_s6, %s1727_s15  ;;  %p1735_p6 = scmp.lt.s32.totalorder %s190_s6, %s190_s6 }
  0x50   : > { %p1736_p9 = scmp.lt.s32.totalorder %s1727_s15, %s1727_s15 }
  0x51   : > { %p1730_p1 = pnand %p1728_p5, %p2422_p10 }
  0x52   : > { %p1737_p8 = por %p1736_p9, %p1735_p6 }
  0x53   : > { %p1731_p3 = pneg %p1730_p1 }
  0x55   : > { %p1738_p0 = pnand %p1737_p8, %p1731_p3 }
  0x57   : > { %1741 = shalt.err (!%p1738_p0)
}
  0x58   : > { %1506 = dma.hbm_to_vmem [thread:$0]  (!%p1941_p12), %s2402_s1, 1024, %s190_s6, [#allocation7], %s1847_s24, %s1847_s24, %s1848_s25  }
  0x59   : > { %s2423_s27 = sshll.u32 %s1844_s21, 10  ;;  %s228_s7 = scalar_lea.vmem [#allocation9], %s1979_s11 }
  0x5a   : > { %s2056_s16 = scalar_lea.hbm %s2404_s3, %s2423_s27  ;;  %s235_s8 = sshll.u32 %s228_s7, 4  ;;  %s2059_s8 = int_to_ptr.vmem [resolvable:$true] %s235_s8 }
  0x5b   : > { %s1742_s18 = scalar_lea.hbm %s2056_s16, 1024  ;;  %p2424_p9 = scmp.ne.s32.totalorder %s2419_s10, 0 }
  0x5c   : > { %p1743_p8 = scmp.ne.s32.totalorder %s2056_s16, %s1742_s18  ;;  %s1747_s30 = scalar_lea.hbm %s2404_s3, 3072 }
  0x5d   : > { %p2425_p2 = pneg %p2424_p9  ;;  %p1748_p7 = scmp.lt.u32.totalorder %s2056_s16, %s2404_s3 }
  0x5e   : > { %p1749_p11 = scmp.lt.u32.totalorder %s1747_s30, %s1742_s18  ;;  %p1751_p5 = scmp.lt.u32.totalorder %s1742_s18, %s2056_s16 }
  0x5f   : > { %p1745_p4 = pnand %p1743_p8, %p2425_p2 }
  0x60   : > { %p1750_p13 = por %p1749_p11, %p1748_p7 }
  0x61   : > { %p1746_p12 = pneg %p1745_p4 }
  0x62   : > { %p1752_p10 = por %p1751_p5, %p1750_p13 }
  0x64   : > { %p1753_p1 = pnand %p1752_p10, %p1746_p12 }
  0x66   : > { %1756 = shalt.err (!%p1753_p1)
}
  0x67   : > { %s1757_s11 = scalar_lea.vmem %s2059_s8, 1024  ;;  %p2426_p6 = pmov %p2425_p2 }
  0x68   : > { %p1758_p3 = scmp.ne.s32.totalorder %s2059_s8, %s1757_s11  ;;  %s1851_s12 = smov [#allocation9]  }
  0x69   : > { %s1762_s27 = sshll.u32 %s1851_s12, 4  ;;  %s1763_s27 = int_to_ptr.vmem [resolvable:$false] %s1762_s27 }
  0x6a   : > { %p1760_p0 = pnand %p1758_p3, %p2426_p6  ;;  %s1764_s13 = scalar_lea.vmem %s1763_s27, 2048 }
  0x6b   : > { %p1765_p2 = scmp.lt.s32.totalorder %s2059_s8, %s1763_s27  ;;  %p1766_p4 = scmp.lt.s32.totalorder %s1764_s13, %s1757_s11 }
  0x6c   : > { %p1761_p8 = pneg %p1760_p0 }
  0x6d   : > { %p1767_p7 = por %p1766_p4, %p1765_p2 }
  0x6f   : > { %p1768_p11 = pnand %p1767_p7, %p1761_p8 }
  0x71   : > { %1771 = shalt.err (!%p1768_p11)
}
  0x72   : > { %1513 = dma.hbm_to_vmem [thread:$0]  (!%p2424_p9), %s2056_s16, 1024, %s2059_s8, %s1996_s9, %s1847_s24, %s1847_s24, %s1848_s25  }
  0x73   : > { %p2427_p12 = scmp.ne.s32.totalorder %s2417_s29, 0 }
  0x74   : > { %p2428_p13 = scmp.eq.s32.totalorder (!%p2427_p12), %s1904_s22, 0 }
  0x75   : > { %253 = sbr.rel (%p2427_p12) target bundleno = 1068 (0x42c), region = 40 }
  0x7c   : > { %1815 = dma.done.wait (%p2428_p13), [#allocation4], 1024   ;;  %p2429_p5 = pmov %p2428_p13 }
  0x7e   : > { %1817 = vsyncadd (%p2429_p5), [#allocation4], 4294966272  ;;  %p2430_p10 = pmov %p2429_p5 }
  0x7f   : > { %p2431_p1 = pmov %p2429_p5 }
  0x80   : > { %1819 = dma.done.wait (%p2430_p10), [#allocation7], 1024  }
  0x81   : > { %1821 = vsyncadd (%p2431_p1), [#allocation7], 4294966272  ;;  %s263_s10 = sand.u32 1, %s1904_s22   ;;  %s265_s24 = sand.u32 1, %s1836_s19  }
  0x82   : > { %s1264_s25 = sshll.u32 %s265_s24, 6  ;;  %s264_s29 = scalar_lea.sflag [#allocation4], %s263_s10 }
  0x83   : > { %s2100_s9 = scalar_lea.vmem [#allocation8], %s1264_s25  ;;  %p2432_p9 = scmp.ne.s32.totalorder %s2416_s28, 0 }
  0x85   : > { %1823 = dma.done.wait (%p2432_p9), %s264_s29, 2048  }
  0x86   : > { %1825 = vsyncadd (%p2432_p9), %s264_s29, 4294965248  ;;  %p306_p3 = scmp.lt.s32.totalorder %s1904_s22, 2  ;;  %s2114_s18 = scalar_lea.vmem [#allocation9], %s1264_s25 }
  0x87   : > { %p2433_p6 = scmp.ne.s32.totalorder %s1904_s22, 0 }
  0x88   : > { %s2108_s14 = scalar_select %p306_p3, %s1904_s22, 2 }
  0x89   : > { %313 = sbr.rel (%p2433_p6) target bundleno = 144 (0x90), region = 60  ;;  %v1560_v0 = vld [vmem:[#allocation6] sm:$0xff] (!%p2433_p6)   ;;  %v1561_v1 = vld [vmem:[#allocation6 + $0x8] sm:$0xff] (!%p2433_p6)   ;;  %v1562_v2 = vld [vmem:[#allocation6 + $0x10] sm:$0xff] (!%p2433_p6)  }
  0x8a   : > { %s308_s8 = scalar_lea.vmem %s2405_s4, %s2108_s14  ;;  %378 = vst [vmem:[#allocation2] sm:$0xff] (!%p2433_p6), %v1560_v0  ;;  %379 = vst [vmem:[#allocation2 + $0x8] sm:$0xff] (!%p2433_p6), %v1561_v1  ;;  %v1563_v3 = vld [vmem:[#allocation6 + $0x18] sm:$0xff] (!%p2433_p6)   ;;  %v1564_v4 = vld [vmem:[#allocation6 + $0x20] sm:$0xff] (!%p2433_p6)  }
  0x8b   : > { %380 = vst [vmem:[#allocation2 + $0x10] sm:$0xff] (!%p2433_p6), %v1562_v2  ;;  %381 = vst [vmem:[#allocation2 + $0x18] sm:$0xff] (!%p2433_p6), %v1563_v3  ;;  %v1565_v5 = vld [vmem:[#allocation6 + $0x28] sm:$0xff] (!%p2433_p6)   ;;  %v1566_v6 = vld [vmem:[#allocation6 + $0x30] sm:$0xff] (!%p2433_p6)  }
  0x8c   : > { %382 = vst [vmem:[#allocation2 + $0x20] sm:$0xff] (!%p2433_p6), %v1564_v4  ;;  %383 = vst [vmem:[#allocation2 + $0x28] sm:$0xff] (!%p2433_p6), %v1565_v5  ;;  %v1567_v7 = vld [vmem:[#allocation6 + $0x38] sm:$0xff] (!%p2433_p6)  }
  0x8d   : > { %384 = vst [vmem:[#allocation2 + $0x30] sm:$0xff] (!%p2433_p6), %v1566_v6  ;;  %385 = vst [vmem:[#allocation2 + $0x38] sm:$0xff] (!%p2433_p6), %v1567_v7 }
  0x90 PF: > { %v1568_v8 = vld [vmem:[%s2114_s18] sm:$0xff]   ;;  %v1569_v9 = vld [vmem:[%s2114_s18 + $0x8] sm:$0xff]   ;;  %v1570_v10 = vld [vmem:[%s2114_s18 + $0x10] sm:$0xff]   ;;  %p1300_p0 = scmp.ge.s32.totalorder %s1904_s22, 2 }
  0x91   : > { %1356 = vmatprep.subr.bf16.mxu0 %v1568_v8  ;;  %v1571_v11 = vld [vmem:[%s2114_s18 + $0x18] sm:$0xff]   ;;  %v386_v12 = vld [vmem:[#allocation2] sm:$0xff]  ;;  %v1573_v14 = vld [vmem:[%s2114_s18 + $0x28] sm:$0xff]  }
  0x92   : > { %1357 = vmatpush3.bf16.msra.mxu0 %v1568_v8  ;;  %1372 = vmatprep.mubr.bf16.mxu0 %v386_v12  ;;  %v1572_v13 = vld [vmem:[%s2114_s18 + $0x20] sm:$0xff]   ;;  %v1574_v15 = vld [vmem:[%s2114_s18 + $0x30] sm:$0xff]   ;;  %v1575_v16 = vld [vmem:[%s2114_s18 + $0x38] sm:$0xff]  }
  0x93   : > { %1358 = vmatprep.subr.bf16.mxu0 %v1569_v9  ;;  %v387_v17 = vld [vmem:[#allocation2 + $0x8] sm:$0xff]  ;;  %v388_v18 = vld [vmem:[#allocation2 + $0x10] sm:$0xff]  ;;  %v389_v19 = vld [vmem:[#allocation2 + $0x18] sm:$0xff] }
  0x94   : > { %v2126_v20 = vld [vmem:[#allocation2 + $0x20] sm:$0xff]  ;;  %v2129_v21 = vld [vmem:[#allocation2 + $0x28] sm:$0xff]  ;;  %v2131_v22 = vld [vmem:[#allocation2 + $0x30] sm:$0xff] }
  0x95   : > { %v2135_v23 = vld [vmem:[#allocation2 + $0x38] sm:$0xff]  ;;  %v2139_v24 = vld [vmem:[%s2100_s9] sm:$0xff]   ;;  %v2144_v25 = vld [vmem:[%s2100_s9 + $0x8] sm:$0xff]  }
  0x96   : > { %1359 = vmatpush3.bf16.msra.mxu0 %v1569_v9  ;;  %v2149_v26 = vld [vmem:[%s2100_s9 + $0x10] sm:$0xff]   ;;  %v2154_v27 = vld [vmem:[%s2100_s9 + $0x18] sm:$0xff]   ;;  %v2159_v28 = vld [vmem:[%s2100_s9 + $0x20] sm:$0xff]  }
  0x97   : > { %1360 = vmatprep.subr.bf16.mxu0 %v1570_v10  ;;  %v2164_v29 = vld [vmem:[%s2100_s9 + $0x28] sm:$0xff]   ;;  %v2169_v30 = vld [vmem:[%s2100_s9 + $0x30] sm:$0xff]   ;;  %v2174_v31 = vld [vmem:[%s2100_s9 + $0x38] sm:$0xff]  }
  0x98   : > { %v1584_v32 = vld [vmem:[#allocation3] sm:$0xff]   ;;  %v1585_v57 = vld [vmem:[#allocation3 + $0x8] sm:$0xff]   ;;  %v1586_v58 = vld [vmem:[#allocation3 + $0x10] sm:$0xff]  }
  0x99   : > { %1404 = vmatprep.mubr.bf16.mxu1 %v1584_v32  ;;  %v1587_v59 = vld [vmem:[#allocation3 + $0x18] sm:$0xff]   ;;  %v1588_v60 = vld [vmem:[#allocation3 + $0x20] sm:$0xff]   ;;  %v1589_v61 = vld [vmem:[#allocation3 + $0x28] sm:$0xff]  }
  0x9a   : > { %1361 = vmatpush3.bf16.msra.mxu0 %v1570_v10  ;;  %v1590_v62 = vld [vmem:[#allocation3 + $0x30] sm:$0xff]   ;;  %v1591_v63 = vld [vmem:[#allocation3 + $0x38] sm:$0xff]   ;;  %v1299_v9 = vld [vmem:[%s308_s8] ss:$0 sm:$0xff] }
  0x9b   : > { %1362 = vmatprep.subr.bf16.mxu0 %v1571_v11 }
  0x9e   : > { %1363 = vmatpush3.bf16.msra.mxu0 %v1571_v11 }
  0x9f   : > { %1364 = vmatprep.subr.bf16.mxu0 %v1572_v13 }
  0xa2   : > { %1365 = vmatpush3.bf16.msra.mxu0 %v1572_v13 }
  0xa3   : > { %1366 = vmatprep.subr.bf16.mxu0 %v1573_v14 }
  0xa6   : > { %1367 = vmatpush3.bf16.msra.mxu0 %v1573_v14 }
  0xa7   : > { %1368 = vmatprep.subr.bf16.mxu0 %v1574_v15 }
  0xaa   : > { %1369 = vmatpush3.bf16.msra.mxu0 %v1574_v15 }
  0xab   : > { %1370 = vmatprep.subr.bf16.mxu0 %v1575_v16 }
  0xae   : > { %1371 = vmatpush3.bf16.msra.mxu0 %v1575_v16 }
  0xaf   : > { %1420 = vmatprep.subr.bf16.mxu0 %v2139_v24 }
  0xb1   : > { %1373 = vmatmul.mubr.bf16.vlgmr.msra.gmra.mrb[0].mxu0 %v387_v17 }
  0xb2   : > { %1376 = vmatprep.mubr.bf16.mxu0 %v388_v18  ;;  %1421 = vmatpush3.bf16.msra.mxu0 %v2139_v24 }
  0xb3   : > { %1422 = vmatprep.subr.bf16.mxu0 %v2144_v25 }
  0xb6   : > { %1423 = vmatpush3.bf16.msra.mxu0 %v2144_v25 }
  0xb7   : > { %1424 = vmatprep.subr.bf16.mxu0 %v2149_v26 }
  0xb9   : > { %1377 = vmatmul.mubr.bf16.gmra.mrb[4].mxu0 %v389_v19 }
  0xba   : > { %1380 = vmatprep.mubr.bf16.mxu0 %v2126_v20  ;;  %1425 = vmatpush3.bf16.msra.mxu0 %v2149_v26 }
  0xbb   : > { %1426 = vmatprep.subr.bf16.mxu0 %v2154_v27 }
  0xbe   : > { %1427 = vmatpush3.bf16.msra.mxu0 %v2154_v27 }
  0xbf   : > { %1428 = vmatprep.subr.bf16.mxu0 %v2159_v28 }
  0xc1   : > { %1381 = vmatmul.mubr.bf16.gmra.mrb[8].mxu0 %v2129_v21 }
  0xc2   : > { %1384 = vmatprep.mubr.bf16.mxu0 %v2131_v22  ;;  %1429 = vmatpush3.bf16.msra.mxu0 %v2159_v28 }
  0xc3   : > { %1430 = vmatprep.subr.bf16.mxu0 %v2164_v29 }
  0xc6   : > { %1431 = vmatpush3.bf16.msra.mxu0 %v2164_v29 }
  0xc7   : > { %1432 = vmatprep.subr.bf16.mxu0 %v2169_v30 }
  0xc9   : > { %1385 = vmatmul.mubr.bf16.gmra.mrb[12].mxu0 %v2135_v23 }
  0xca   : > { %1436 = vmatprep.mubr.bf16.mxu0 %v386_v12  ;;  %1433 = vmatpush3.bf16.msra.mxu0 %v2169_v30 }
  0xcb   : > { %1434 = vmatprep.subr.bf16.mxu0 %v2174_v31 }
  0xce   : > { %1435 = vmatpush3.bf16.msra.mxu0 %v2174_v31 }
  0xd1   : > { %1437 = vmatmul.mubr.bf16.vlgmr.msra.gmra.mrb[16].mxu0 %v387_v17 }
  0xd2   : > { %1440 = vmatprep.mubr.bf16.mxu0 %v388_v18 }
  0xd9   : > { %1441 = vmatmul.mubr.bf16.gmra.mrb[20].mxu0 %v389_v19 }
 0x184   : > { %v1374_v33 = vpop.f32.mrb[0].mxu0 }
 0x185   : > { %v509_v34 = vpop.f32.mrb[1].mxu0 }
 0x186   : > { %v1375_v35 = vpop.f32.mrb[2].mxu0 }
 0x187   : > { %v589_v36 = vpack.c.bf16 %v1375_v35, %v1374_v33  ;;  %v512_v37 = vpop.f32.mrb[3].mxu0 }
 0x188   : > { %v588_v38 = vpack.c.bf16 %v512_v37, %v509_v34 }
 0x18a   : > { %1388 = vmatprep.subr.bf16.mxu1 %v588_v38 }
 0x18b   : > { %1389 = vmatpush3.bf16.msra.mxu1 %v588_v38 }
 0x18c   : > { %v1378_v39 = vpop.f32.mrb[4].mxu0  ;;  %1390 = vmatprep.subr.bf16.mxu1 %v589_v36 }
 0x18d   : > { %v525_v40 = vpop.f32.mrb[5].mxu0 }
 0x18e   : > { %v1379_v41 = vpop.f32.mrb[6].mxu0 }
 0x18f   : > { %v591_v42 = vpack.c.bf16 %v1379_v41, %v1378_v39  ;;  %v528_v43 = vpop.f32.mrb[7].mxu0  ;;  %1391 = vmatpush3.bf16.msra.mxu1 %v589_v36 }
 0x190   : > { %v590_v44 = vpack.c.bf16 %v528_v43, %v525_v40 }
 0x192   : > { %1392 = vmatprep.subr.bf16.mxu1 %v590_v44 }
 0x193   : > { %1393 = vmatpush3.bf16.msra.mxu1 %v590_v44 }
 0x194   : > { %v1382_v45 = vpop.f32.mrb[8].mxu0  ;;  %1394 = vmatprep.subr.bf16.mxu1 %v591_v42 }
 0x195   : > { %v541_v46 = vpop.f32.mrb[9].mxu0 }
 0x196   : > { %v1383_v47 = vpop.f32.mrb[10].mxu0 }
 0x197   : > { %v593_v48 = vpack.c.bf16 %v1383_v47, %v1382_v45  ;;  %v544_v49 = vpop.f32.mrb[11].mxu0  ;;  %1395 = vmatpush3.bf16.msra.mxu1 %v591_v42 }
 0x198   : > { %v592_v50 = vpack.c.bf16 %v544_v49, %v541_v46 }
 0x19a   : > { %1396 = vmatprep.subr.bf16.mxu1 %v592_v50 }
 0x19b   : > { %1397 = vmatpush3.bf16.msra.mxu1 %v592_v50 }
 0x19c   : > { %v1386_v51 = vpop.f32.mrb[12].mxu0  ;;  %1398 = vmatprep.subr.bf16.mxu1 %v593_v48 }
 0x19d   : > { %v557_v52 = vpop.f32.mrb[13].mxu0 }
 0x19e   : > { %v1387_v53 = vpop.f32.mrb[14].mxu0 }
 0x19f   : > { %v595_v54 = vpack.c.bf16 %v1387_v53, %v1386_v51  ;;  %v560_v55 = vpop.f32.mrb[15].mxu0  ;;  %1399 = vmatpush3.bf16.msra.mxu1 %v593_v48 }
 0x1a0   : > { %v594_v56 = vpack.c.bf16 %v560_v55, %v557_v52 }
 0x1a2   : > { %1400 = vmatprep.subr.bf16.mxu1 %v594_v56 }
 0x1a3   : > { %1401 = vmatpush3.bf16.msra.mxu1 %v594_v56 }
 0x1a4   : > { %1402 = vmatprep.subr.bf16.mxu1 %v595_v54  ;;  %v1438_v0 = vpop.f32.mrb[16].mxu0 }
 0x1a5   : > { %v823_v1 = vpop.f32.mrb[17].mxu0 }
 0x1a6   : > { %v1439_v2 = vpop.f32.mrb[18].mxu0 }
 0x1a7   : > { %1403 = vmatpush3.bf16.msra.mxu1 %v595_v54  ;;  %v826_v3 = vpop.f32.mrb[19].mxu0 }
 0x1a8   : > { %1452 = vmatprep.subr.bf16.mxu1 %v2139_v24 }
 0x1aa   : > { %1405 = vmatmul.mubr.bf16.vlgmr.msra.gmra.mrb[0].mxu1 %v1585_v57 }
 0x1ab   : > { %1460 = vmatpush3.bf16.msra.mxu1 %v2139_v24  ;;  %1408 = vmatprep.mubr.bf16.mxu1 %v1586_v58 }
 0x1ac   : > { %1453 = vmatprep.subr.bf16.mxu1 %v2144_v25  ;;  %v1442_v4 = vpop.f32.mrb[20].mxu0 }
 0x1ad   : > { %v839_v5 = vpop.f32.mrb[21].mxu0 }
 0x1ae   : > { %v1443_v6 = vpop.f32.mrb[22].mxu0 }
 0x1af   : > { %1461 = vmatpush3.bf16.msra.mxu1 %v2144_v25  ;;  %v842_v7 = vpop.f32.mrb[23].mxu0 }
 0x1b0   : > { %1454 = vmatprep.subr.bf16.mxu1 %v2149_v26 }
 0x1b2   : > { %1409 = vmatmul.mubr.bf16.gmra.mrb[4].mxu1 %v1587_v59 }
 0x1b3   : > { %1462 = vmatpush3.bf16.msra.mxu1 %v2149_v26  ;;  %1412 = vmatprep.mubr.bf16.mxu1 %v1588_v60 }
 0x1b4   : > { %1455 = vmatprep.subr.bf16.mxu1 %v2154_v27 }
 0x1b7   : > { %1463 = vmatpush3.bf16.msra.mxu1 %v2154_v27 }
 0x1b8   : > { %1456 = vmatprep.subr.bf16.mxu1 %v2159_v28 }
 0x1ba   : > { %1413 = vmatmul.mubr.bf16.gmra.mrb[8].mxu1 %v1589_v61 }
 0x1bb   : > { %1464 = vmatpush3.bf16.msra.mxu1 %v2159_v28  ;;  %1416 = vmatprep.mubr.bf16.mxu1 %v1590_v62 }
 0x1bc   : > { %1457 = vmatprep.subr.bf16.mxu1 %v2164_v29 }
 0x1bf   : > { %1465 = vmatpush3.bf16.msra.mxu1 %v2164_v29 }
 0x1c0   : > { %1458 = vmatprep.subr.bf16.mxu1 %v2169_v30 }
 0x1c2   : > { %1417 = vmatmul.mubr.bf16.gmra.mrb[12].mxu1 %v1591_v63 }
 0x1c3   : > { %1466 = vmatpush3.bf16.msra.mxu1 %v2169_v30  ;;  %1444 = vmatprep.mubr.bf16.mxu1 %v2126_v20 }
 0x1c4   : > { %1459 = vmatprep.subr.bf16.mxu1 %v2174_v31 }
 0x1c7   : > { %1467 = vmatpush3.bf16.msra.mxu1 %v2174_v31 }
 0x1ca   : > { %1445 = vmatmul.mubr.bf16.vlgmr.msra.gmra.mrb[8].mxu1 %v2129_v21 }
 0x1cb   : > { %1448 = vmatprep.mubr.bf16.mxu1 %v2131_v22 }
 0x1d2   : > { %1449 = vmatmul.mubr.bf16.gmra.mrb[12].mxu1 %v2135_v23 }
 0x27d   : > { %v1406_v8 = vpop.f32.mrb[0].mxu1 }
 0x27e   : > { %v832_v10 = vadd.f32 %v1438_v0, %v1406_v8  ;;  %v678_v11 = vpop.f32.mrb[1].mxu1 }
 0x27f   : > { %v824_v12 = vadd.f32 %v823_v1, %v678_v11  ;;  %v1407_v13 = vpop.f32.mrb[2].mxu1 }
 0x280   : > { %v2203_v14 = vadd.f32 %v1299_v9, %v832_v10  ;;  %v835_v15 = vadd.f32 %v1439_v2, %v1407_v13  ;;  %v681_v16 = vpop.f32.mrb[3].mxu1 }
 0x281   : > { %v2205_v17 = vadd.f32 %v1299_v9, %v824_v12  ;;  %v827_v18 = vadd.f32 %v826_v3, %v681_v16 }
 0x282   : > { %v2207_v19 = vadd.f32 %v1299_v9, %v835_v15  ;;  %v914_v51 = vmax.f32 (!%p1300_p0), %v2203_v14, 0.0 }
 0x283   : > { %v2209_v20 = vadd.f32 %v1299_v9, %v827_v18  ;;  %v912_v49 = vmax.f32 (!%p1300_p0), %v2205_v17, 0.0 }
 0x284   : > { %v915_v52 = vmax.f32 (!%p1300_p0), %v2207_v19, 0.0 }
 0x285   : > { %v1410_v21 = vpop.f32.mrb[4].mxu1  ;;  %v913_v50 = vmax.f32 (!%p1300_p0), %v2209_v20, 0.0 }
 0x286   : > { %v848_v22 = vadd.f32 %v1442_v4, %v1410_v21  ;;  %v694_v23 = vpop.f32.mrb[5].mxu1  ;;  %v929_v58 = vpack.c.bf16 (!%p1300_p0), %v915_v52, %v914_v51 }
 0x287   : > { %v840_v24 = vadd.f32 %v839_v5, %v694_v23  ;;  %v1411_v25 = vpop.f32.mrb[6].mxu1  ;;  %v928_v57 = vpack.c.bf16 (!%p1300_p0), %v913_v50, %v912_v49 }
 0x288   : > { %v2211_v26 = vadd.f32 %v1299_v9, %v848_v22  ;;  %v851_v27 = vadd.f32 %v1443_v6, %v1411_v25  ;;  %v697_v28 = vpop.f32.mrb[7].mxu1  ;;  %937 = vst [vmem:[#allocation2 + $0x8] sm:$0xff] (!%p1300_p0), %v929_v58 }
 0x289   : > { %v2213_v29 = vadd.f32 %v1299_v9, %v840_v24  ;;  %v843_v30 = vadd.f32 %v842_v7, %v697_v28  ;;  %936 = vst [vmem:[#allocation2] sm:$0xff] (!%p1300_p0), %v928_v57 }
 0x28a   : > { %v2215_v31 = vadd.f32 %v1299_v9, %v851_v27  ;;  %v918_v55 = vmax.f32 (!%p1300_p0), %v2211_v26, 0.0 }
 0x28b   : > { %v2217_v32 = vadd.f32 %v1299_v9, %v843_v30  ;;  %v916_v53 = vmax.f32 (!%p1300_p0), %v2213_v29, 0.0 }
 0x28c   : > { %v919_v56 = vmax.f32 (!%p1300_p0), %v2215_v31, 0.0 }
 0x28d   : > { %v917_v54 = vmax.f32 (!%p1300_p0), %v2217_v32, 0.0 }
 0x28e   : > { %v931_v62 = vpack.c.bf16 (!%p1300_p0), %v919_v56, %v918_v55 }
 0x28f   : > { %v930_v61 = vpack.c.bf16 (!%p1300_p0), %v917_v54, %v916_v53 }
 0x290   : > { %939 = vst [vmem:[#allocation2 + $0x18] sm:$0xff] (!%p1300_p0), %v931_v62 }
 0x291   : > { %938 = vst [vmem:[#allocation2 + $0x10] sm:$0xff] (!%p1300_p0), %v930_v61 }
 0x29d   : > { %v1446_v33 = vpop.f32.mrb[8].mxu1 }
 0x29e   : > { %v2219_v34 = vadd.f32 %v1446_v33, %v1299_v9  ;;  %v855_v35 = vpop.f32.mrb[9].mxu1 }
 0x29f   : > { %v2221_v36 = vadd.f32 %v1299_v9, %v855_v35  ;;  %v1447_v37 = vpop.f32.mrb[10].mxu1 }
 0x2a0   : > { %v2223_v38 = vadd.f32 %v1447_v37, %v1299_v9  ;;  %v858_v39 = vpop.f32.mrb[11].mxu1  ;;  %v922_v63 = vmax.f32 (!%p1300_p0), %v2219_v34, 0.0 }
 0x2a1   : > { %v2225_v40 = vadd.f32 %v1299_v9, %v858_v39  ;;  %v920_v59 = vmax.f32 (!%p1300_p0), %v2221_v36, 0.0 }
 0x2a2   : > { %v923_v0 = vmax.f32 (!%p1300_p0), %v2223_v38, 0.0 }
 0x2a3   : > { %911 = sbr.rel (%p1300_p0) target bundleno = 688 (0x2b0), region = 64  ;;  %v921_v60 = vmax.f32 (!%p1300_p0), %v2225_v40, 0.0 }
 0x2a4   : > { %v933_v5 = vpack.c.bf16 (!%p1300_p0), %v923_v0, %v922_v63 }
 0x2a5   : > { %v1450_v41 = vpop.f32.mrb[12].mxu1  ;;  %v932_v1 = vpack.c.bf16 (!%p1300_p0), %v921_v60, %v920_v59 }
 0x2a6   : > { %v2227_v42 = vadd.f32 %v1450_v41, %v1299_v9  ;;  %v871_v43 = vpop.f32.mrb[13].mxu1  ;;  %941 = vst [vmem:[#allocation2 + $0x28] sm:$0xff] (!%p1300_p0), %v933_v5 }
 0x2a7   : > { %v2229_v44 = vadd.f32 %v1299_v9, %v871_v43  ;;  %v1451_v45 = vpop.f32.mrb[14].mxu1  ;;  %940 = vst [vmem:[#allocation2 + $0x20] sm:$0xff] (!%p1300_p0), %v932_v1 }
 0x2a8   : > { %v2231_v46 = vadd.f32 %v1451_v45, %v1299_v9  ;;  %v874_v47 = vpop.f32.mrb[15].mxu1  ;;  %v926_v4 = vmax.f32 (!%p1300_p0), %v2227_v42, 0.0 }
 0x2a9   : > { %v2233_v48 = vadd.f32 %v1299_v9, %v874_v47  ;;  %v924_v2 = vmax.f32 (!%p1300_p0), %v2229_v44, 0.0 }
 0x2aa   : > { %v927_v6 = vmax.f32 %v2231_v46, 0.0 }
 0x2ab   : > { %v925_v3 = vmax.f32 %v2233_v48, 0.0 }
 0x2ac   : > { %v935_v8 = vpack.c.bf16 %v927_v6, %v926_v4 }
 0x2ad   : > { %v934_v7 = vpack.c.bf16 %v925_v3, %v924_v2 }
 0x2ae   : > { %943 = vst [vmem:[#allocation2 + $0x38] sm:$0xff] %v935_v8 }
 0x2af   : > { %942 = vst [vmem:[#allocation2 + $0x30] sm:$0xff] %v934_v7 }
 0x2b0 PF: > { %p1301_p8 = scmp.ne.s32.totalorder %s1904_s22, 2 }
 0x2b1   : > { %v948_v9 = vlaneseq (!%p1301_p8) }
 0x2b2   : > { %947 = sbr.rel (%p1301_p8) target bundleno = 1042 (0x412), region = 68 }
 0x2b3   : > { %v949_v10 = vand.u32 (!%p1301_p8), 127, %v948_v9 }
 0x2b5   : > { %vm950_vm0 = vcmp.lt.s32.totalorder (!%p1301_p8), %v949_v10, 4 }
 0x2b6   : > { %v951_v11 = vsel (!%p1301_p8), %vm950_vm0, %v2205_v17, -1e+30  ;;  %v953_v12 = vsel (!%p1301_p8), %vm950_vm0, %v2203_v14, -1e+30  ;;  %v952_v13 = vsel (!%p1301_p8), %vm950_vm0, %v2209_v20, -1e+30 }
 0x2b7   : > { %967 = vmax.xlane.f32.xlu0 (!%p1301_p8), %v951_v11  ;;  %971 = vmax.xlane.f32.xlu1 (!%p1301_p8), %v953_v12  ;;  %v954_v15 = vsel (!%p1301_p8), %vm950_vm0, %v2207_v19, -1e+30  ;;  %v955_v16 = vsel (!%p1301_p8), %vm950_vm0, %v2213_v29, -1e+30  ;;  %v956_v18 = vsel (!%p1301_p8), %vm950_vm0, %v2217_v32, -1e+30 }
 0x2b8   : > { %v957_v14 = vsel (!%p1301_p8), %vm950_vm0, %v2211_v26, -1e+30  ;;  %v958_v17 = vsel (!%p1301_p8), %vm950_vm0, %v2215_v31, -1e+30  ;;  %v959_v19 = vsel (!%p1301_p8), %vm950_vm0, %v2221_v36, -1e+30 }
 0x2b9   : > { %v960_v20 = vsel %vm950_vm0, %v2225_v40, -1e+30  ;;  %v961_v21 = vsel %vm950_vm0, %v2219_v34, -1e+30  ;;  %v962_v22 = vsel %vm950_vm0, %v2223_v38, -1e+30 }
 0x2ba   : > { %v2279_v23 = vsel %vm950_vm0, %v2229_v44, -1e+30  ;;  %v2283_v24 = vsel %vm950_vm0, %v2233_v48, -1e+30  ;;  %v2289_v25 = vsel %vm950_vm0, %v2227_v42, -1e+30 }
 0x2bb   : > { %969 = vmax.xlane.f32.xlu0 %v952_v13  ;;  %973 = vmax.xlane.f32.xlu1 %v954_v15  ;;  %v2293_v26 = vsel %vm950_vm0, %v2231_v46, -1e+30 }
 0x2bf   : > { %975 = vmax.xlane.f32.xlu0 %v955_v16  ;;  %977 = vmax.xlane.f32.xlu1 %v956_v18 }
 0x2c3   : > { %979 = vmax.xlane.f32.xlu0 %v957_v14  ;;  %981 = vmax.xlane.f32.xlu1 %v958_v17 }
 0x2c7   : > { %983 = vmax.xlane.f32.xlu0 %v959_v19  ;;  %985 = vmax.xlane.f32.xlu1 %v960_v20 }
 0x2cb   : > { %987 = vmax.xlane.f32.xlu0 %v961_v21  ;;  %989 = vmax.xlane.f32.xlu1 %v962_v22 }
 0x2cf   : > { %991 = vmax.xlane.f32.xlu0 %v2279_v23  ;;  %993 = vmax.xlane.f32.xlu1 %v2283_v24 }
 0x2d3   : > { %995 = vmax.xlane.f32.xlu0 %v2289_v25  ;;  %997 = vmax.xlane.f32.xlu1 %v2293_v26 }
 0x344   : > { %v968_v27 = vpop.xlane.xlu0 %967  ;;  %v972_v28 = vpop.xlane.xlu1 %971 }
 0x345   : > { %v2297_v29 = vsub.f32 %v951_v11, %v968_v27  ;;  %v2299_v30 = vsub.f32 %v953_v12, %v972_v28 }
 0x347   : > { %v1015_v31 = vmul.f32 1.442695, %v2297_v29  ;;  %v1019_v32 = vmul.f32 1.442695, %v2299_v30 }
 0x348   : > { %v970_v33 = vpop.xlane.xlu0 %969  ;;  %v974_v34 = vpop.xlane.xlu1 %973 }
 0x349   : > { %1592 = vpow2.f32 %v1015_v31  ;;  %v2303_v35 = vsub.f32 %v952_v13, %v970_v33  ;;  %v2305_v36 = vsub.f32 %v954_v15, %v974_v34 }
 0x34a   : > { %1594 = vpow2.f32 %v1019_v32 }
 0x34b   : > { %v1017_v37 = vmul.f32 1.442695, %v2303_v35  ;;  %v1021_v38 = vmul.f32 1.442695, %v2305_v36 }
 0x34c   : > { %v976_v39 = vpop.xlane.xlu0 %975  ;;  %v978_v40 = vpop.xlane.xlu1 %977 }
 0x34d   : > { %1596 = vpow2.f32 %v1017_v37  ;;  %v2309_v41 = vsub.f32 %v955_v16, %v976_v39  ;;  %v2311_v42 = vsub.f32 %v956_v18, %v978_v40 }
 0x34e   : > { %1598 = vpow2.f32 %v1021_v38 }
 0x34f   : > { %v1023_v43 = vmul.f32 1.442695, %v2309_v41  ;;  %v1025_v44 = vmul.f32 1.442695, %v2311_v42 }
 0x350   : > { %v980_v45 = vpop.xlane.xlu0 %979  ;;  %v982_v46 = vpop.xlane.xlu1 %981 }
 0x351   : > { %1600 = vpow2.f32 %v1023_v43  ;;  %v2315_v47 = vsub.f32 %v957_v14, %v980_v45  ;;  %v2317_v48 = vsub.f32 %v958_v17, %v982_v46 }
 0x352   : > { %1602 = vpow2.f32 %v1025_v44 }
 0x353   : > { %v1593_v49 = vpop.eup %1592  ;;  %v1027_v50 = vmul.f32 1.442695, %v2315_v47  ;;  %v1029_v51 = vmul.f32 1.442695, %v2317_v48 }
 0x354   : > { %1047 = vadd.xlane.f32.xlu0 %v1593_v49  ;;  %v984_v52 = vpop.xlane.xlu0 %983  ;;  %v986_v53 = vpop.xlane.xlu1 %985 }
 0x355   : > { %v1595_v54 = vpop.eup %1594  ;;  %1604 = vpow2.f32 %v1027_v50  ;;  %v2321_v55 = vsub.f32 %v959_v19, %v984_v52  ;;  %v2323_v56 = vsub.f32 %v960_v20, %v986_v53 }
 0x356   : > { %1606 = vpow2.f32 %v1029_v51 }
 0x357   : > { %v1597_v57 = vpop.eup %1596  ;;  %v1031_v58 = vmul.f32 1.442695, %v2321_v55  ;;  %v1033_v59 = vmul.f32 1.442695, %v2323_v56 }
 0x358   : > { %1051 = vadd.xlane.f32.xlu0 %v1595_v54  ;;  %1049 = vadd.xlane.f32.xlu1 %v1597_v57  ;;  %v988_v60 = vpop.xlane.xlu0 %987  ;;  %v990_v61 = vpop.xlane.xlu1 %989 }
 0x359   : > { %v1599_v62 = vpop.eup %1598  ;;  %1608 = vpow2.f32 %v1031_v58  ;;  %v2327_v63 = vsub.f32 %v961_v21, %v988_v60  ;;  %v2329_v0 = vsub.f32 %v962_v22, %v990_v61 }
 0x35a   : > { %1610 = vpow2.f32 %v1033_v59 }
 0x35b   : > { %v1601_v1 = vpop.eup %1600  ;;  %v1035_v2 = vmul.f32 1.442695, %v2327_v63  ;;  %v1037_v3 = vmul.f32 1.442695, %v2329_v0 }
 0x35c   : > { %1053 = vadd.xlane.f32.xlu1 %v1599_v62  ;;  %1055 = vadd.xlane.f32.xlu0 %v1601_v1  ;;  %v992_v4 = vpop.xlane.xlu0 %991  ;;  %v994_v5 = vpop.xlane.xlu1 %993 }
 0x35d   : > { %v1603_v6 = vpop.eup %1602  ;;  %1612 = vpow2.f32 %v1035_v2  ;;  %v2334_v7 = vsub.f32 %v2279_v23, %v992_v4  ;;  %v2337_v8 = vsub.f32 %v2283_v24, %v994_v5 }
 0x35e   : > { %1614 = vpow2.f32 %v1037_v3 }
 0x35f   : > { %v1605_v9 = vpop.eup %1604  ;;  %v1039_v10 = vmul.f32 1.442695, %v2334_v7  ;;  %v1041_v11 = vmul.f32 1.442695, %v2337_v8 }
 0x360   : > { %1057 = vadd.xlane.f32.xlu1 %v1603_v6  ;;  %1059 = vadd.xlane.f32.xlu0 %v1605_v9  ;;  %v996_v12 = vpop.xlane.xlu0 %995  ;;  %v998_v13 = vpop.xlane.xlu1 %997 }
 0x361   : > { %v1607_v15 = vpop.eup %1606  ;;  %1616 = vpow2.f32 %v1039_v10  ;;  %v2342_v16 = vsub.f32 %v2289_v25, %v996_v12  ;;  %v2345_v18 = vsub.f32 %v2293_v26, %v998_v13 }
 0x362   : > { %1618 = vpow2.f32 %v1041_v11 }
 0x363   : > { %v1609_v14 = vpop.eup %1608  ;;  %v1043_v17 = vmul.f32 1.442695, %v2342_v16  ;;  %v1045_v19 = vmul.f32 1.442695, %v2345_v18 }
 0x364   : > { %1061 = vadd.xlane.f32.xlu1 %v1607_v15  ;;  %1063 = vadd.xlane.f32.xlu0 %v1609_v14  ;;  %v1611_v20 = vpop.eup %1610 }
 0x365   : > { %1620 = vpow2.f32 %v1043_v17 }
 0x366   : > { %1622 = vpow2.f32 %v1045_v19 }
 0x367   : > { %v1613_v21 = vpop.eup %1612 }
 0x368   : > { %1065 = vadd.xlane.f32.xlu1 %v1611_v20  ;;  %1067 = vadd.xlane.f32.xlu0 %v1613_v21  ;;  %v1615_v22 = vpop.eup %1614 }
 0x36b   : > { %v1617_v23 = vpop.eup %1616 }
 0x36c   : > { %1069 = vadd.xlane.f32.xlu1 %v1615_v22  ;;  %1071 = vadd.xlane.f32.xlu0 %v1617_v23  ;;  %v1619_v24 = vpop.eup %1618 }
 0x36f   : > { %v1621_v25 = vpop.eup %1620 }
 0x370   : > { %1073 = vadd.xlane.f32.xlu1 %v1619_v24  ;;  %1075 = vadd.xlane.f32.xlu0 %v1621_v25  ;;  %v1623_v26 = vpop.eup %1622 }
 0x374   : > { %1077 = vadd.xlane.f32.xlu1 %v1623_v26 }
 0x3e1   : > { %v1048_v27 = vpop.xlane.xlu0 %1047 }
 0x3e2   : > { %1624 = vlog2.f32 %v1048_v27 }
 0x3e5   : > { %v1050_v28 = vpop.xlane.xlu1 %1049  ;;  %v1052_v31 = vpop.xlane.xlu0 %1051 }
 0x3e6   : > { %1626 = vlog2.f32 %v1050_v28 }
 0x3e7   : > { %1628 = vlog2.f32 %v1052_v31 }
 0x3e9   : > { %v1054_v32 = vpop.xlane.xlu1 %1053  ;;  %v1056_v33 = vpop.xlane.xlu0 %1055 }
 0x3ea   : > { %1630 = vlog2.f32 %v1054_v32 }
 0x3eb   : > { %1632 = vlog2.f32 %v1056_v33 }
 0x3ec   : > { %v1625_v34 = vpop.eup %1624 }
 0x3ed   : > { %v1080_v37 = vmul.f32 0.6931472, %v1625_v34  ;;  %v1058_v38 = vpop.xlane.xlu1 %1057  ;;  %v1060_v39 = vpop.xlane.xlu0 %1059 }
 0x3ee   : > { %1634 = vlog2.f32 %v1058_v38 }
 0x3ef   : > { %v1111_v40 = vsub.f32 %v2297_v29, %v1080_v37  ;;  %1636 = vlog2.f32 %v1060_v39 }
 0x3f0   : > { %v1627_v43 = vpop.eup %1626 }
 0x3f1   : > { %v1629_v44 = vpop.eup %1628  ;;  %1127 = vst [vmem:[#allocation10] sm:$0xff] %v1111_v40  ;;  %v1082_v45 = vmul.f32 0.6931472, %v1627_v43  ;;  %v1062_v46 = vpop.xlane.xlu1 %1061 }
 0x3f2   : > { %v1064_v49 = vpop.xlane.xlu0 %1063  ;;  %v1084_v50 = vmul.f32 0.6931472, %v1629_v44  ;;  %1638 = vlog2.f32 %v1062_v46 }
 0x3f3   : > { %v1112_v51 = vsub.f32 %v2303_v35, %v1082_v45  ;;  %1640 = vlog2.f32 %v1064_v49 }
 0x3f4   : > { %v1631_v52 = vpop.eup %1630  ;;  %v1113_v53 = vsub.f32 %v2299_v30, %v1084_v50 }
 0x3f5   : > { %v1633_v54 = vpop.eup %1632  ;;  %1128 = vst [vmem:[#allocation10 + $0x8] sm:$0xff] %v1112_v51  ;;  %v1086_v57 = vmul.f32 0.6931472, %v1631_v52  ;;  %v1066_v58 = vpop.xlane.xlu1 %1065 }
 0x3f6   : > { %v1068_v29 = vpop.xlane.xlu0 %1067  ;;  %1129 = vst [vmem:[#allocation10 + $0x10] sm:$0xff] %v1113_v53  ;;  %v1088_v59 = vmul.f32 0.6931472, %v1633_v54  ;;  %1642 = vlog2.f32 %v1066_v58 }
 0x3f7   : > { %v1114_v60 = vsub.f32 %v2305_v36, %v1086_v57  ;;  %1644 = vlog2.f32 %v1068_v29 }
 0x3f8   : > { %v1635_v61 = vpop.eup %1634  ;;  %v1115_v62 = vsub.f32 %v2309_v41, %v1088_v59 }
 0x3f9   : > { %v1637_v1 = vpop.eup %1636  ;;  %1130 = vst [vmem:[#allocation10 + $0x18] sm:$0xff] %v1114_v60  ;;  %v1090_v35 = vmul.f32 0.6931472, %v1635_v61  ;;  %v1070_v2 = vpop.xlane.xlu1 %1069 }
 0x3fa   : > { %v1072_v3 = vpop.xlane.xlu0 %1071  ;;  %1131 = vst [vmem:[#allocation10 + $0x20] sm:$0xff] %v1115_v62  ;;  %v1092_v30 = vmul.f32 0.6931472, %v1637_v1  ;;  %1646 = vlog2.f32 %v1070_v2 }
 0x3fb   : > { %v1116_v4 = vsub.f32 %v2311_v42, %v1090_v35  ;;  %1648 = vlog2.f32 %v1072_v3 }
 0x3fc   : > { %v1639_v5 = vpop.eup %1638  ;;  %v1117_v6 = vsub.f32 %v2315_v47, %v1092_v30 }
 0x3fd   : > { %v1641_v9 = vpop.eup %1640  ;;  %1132 = vst [vmem:[#allocation10 + $0x28] sm:$0xff] %v1116_v4  ;;  %v1094_v36 = vmul.f32 0.6931472, %v1639_v5  ;;  %v1074_v10 = vpop.xlane.xlu1 %1073 }
 0x3fe   : > { %v1076_v11 = vpop.xlane.xlu0 %1075  ;;  %1133 = vst [vmem:[#allocation10 + $0x30] sm:$0xff] %v1117_v6  ;;  %v1096_v41 = vmul.f32 0.6931472, %v1641_v9  ;;  %1650 = vlog2.f32 %v1074_v10 }
 0x3ff   : > { %v1118_v12 = vsub.f32 %v2317_v48, %v1094_v36  ;;  %1652 = vlog2.f32 %v1076_v11 }
 0x400   : > { %v1643_v13 = vpop.eup %1642  ;;  %v1119_v15 = vsub.f32 %v2321_v55, %v1096_v41 }
 0x401   : > { %v1645_v14 = vpop.eup %1644  ;;  %1134 = vst [vmem:[#allocation10 + $0x38] sm:$0xff] %v1118_v12  ;;  %v1098_v42 = vmul.f32 0.6931472, %v1643_v13  ;;  %v1078_v17 = vpop.xlane.xlu1 %1077 }
 0x402   : > { %1135 = vst [vmem:[#allocation10 + $0x40] sm:$0xff] %v1119_v15  ;;  %v1100_v47 = vmul.f32 0.6931472, %v1645_v14  ;;  %1654 = vlog2.f32 %v1078_v17 }
 0x403   : > { %v1120_v19 = vsub.f32 %v2323_v56, %v1098_v42 }
 0x404   : > { %v1647_v20 = vpop.eup %1646  ;;  %v1121_v21 = vsub.f32 %v2327_v63, %v1100_v47 }
 0x405   : > { %v1649_v22 = vpop.eup %1648  ;;  %1136 = vst [vmem:[#allocation10 + $0x48] sm:$0xff] %v1120_v19  ;;  %v1102_v23 = vmul.f32 0.6931472, %v1647_v20 }
 0x406   : > { %1137 = vst [vmem:[#allocation10 + $0x50] sm:$0xff] %v1121_v21  ;;  %v1104_v48 = vmul.f32 0.6931472, %v1649_v22 }
 0x407   : > { %v1122_v24 = vsub.f32 %v2329_v0, %v1102_v23 }
 0x408   : > { %v1651_v55 = vpop.eup %1650  ;;  %v1123_v25 = vsub.f32 %v2334_v7, %v1104_v48 }
 0x409   : > { %v1653_v26 = vpop.eup %1652  ;;  %1138 = vst [vmem:[#allocation10 + $0x58] sm:$0xff] %v1122_v24  ;;  %v1106_v27 = vmul.f32 0.6931472, %v1651_v55 }
 0x40a   : > { %1139 = vst [vmem:[#allocation10 + $0x60] sm:$0xff] %v1123_v25  ;;  %v1108_v28 = vmul.f32 0.6931472, %v1653_v26 }
 0x40b   : > { %v1124_v56 = vsub.f32 %v2337_v8, %v1106_v27 }
 0x40c   : > { %v1655_v31 = vpop.eup %1654  ;;  %v1125_v63 = vsub.f32 %v2342_v16, %v1108_v28 }
 0x40d   : > { %1140 = vst [vmem:[#allocation10 + $0x68] sm:$0xff] %v1124_v56  ;;  %v1110_v32 = vmul.f32 0.6931472, %v1655_v31 }
 0x40e   : > { %1141 = vst [vmem:[#allocation10 + $0x70] sm:$0xff] %v1125_v63 }
 0x40f   : > { %v1126_v33 = vsub.f32 %v2345_v18, %v1110_v32 }
 0x411   : > { %1142 = vst [vmem:[#allocation10 + $0x78] sm:$0xff] %v1126_v33 }
 0x412 PF: > { %p1519_p2 = scmp.eq.s32.totalorder %s1904_s22, 2  ;;  %s1852_s6 = smov [#allocation10]  }
 0x413   : > { %s1149_s30 = sshll.u32 %s1852_s6, 4  ;;  %s1150_s30 = int_to_ptr.vmem [resolvable:$true] %s1149_s30 }
 0x414   : > { %s1772_s15 = scalar_lea.vmem %s1150_s30, 2048  ;;  %p1779_p12 = scmp.lt.s32.totalorder %s1150_s30, %s1150_s30 }
 0x415   : > { %p1773_p4 = scmp.ne.s32.totalorder %s1150_s30, %s1772_s15  ;;  %p1780_p13 = scmp.lt.s32.totalorder %s1772_s15, %s1772_s15 }
 0x417   : > { %p1774_p7 = pnand %p1773_p4, %p1519_p2  ;;  %p1781_p5 = por %p1780_p13, %p1779_p12 }
 0x419   : > { %p1775_p11 = pneg %p1774_p7 }
 0x41b   : > { %p1782_p10 = pnand %p1781_p5, %p1775_p11 }
 0x41d   : > { %1785 = shalt.err (!%p1782_p10)
}
 0x41e   : > { %s1786_s12 = scalar_lea.hbm %s2406_s5, 2048 }
 0x41f   : > { %p1787_p1 = scmp.ne.s32.totalorder %s2406_s5, %s1786_s12  ;;  %p1792_p6 = scmp.lt.u32.totalorder %s1786_s12, %s2406_s5 }
 0x421   : > { %p1788_p9 = pnand %p1787_p1, %p1519_p2 }
 0x423   : > { %p1789_p3 = pneg %p1788_p9 }
 0x425   : > { %p1794_p0 = pnand %p1792_p6, %p1789_p3 }
 0x427   : > { %1797 = shalt.err (!%p1794_p0)
}
 0x428   : > { %s1853_s25 = smov 128   ;;  %s1854_s29 = smov 8  }
 0x429   : > { %1497 = dma.vmem_to_hbm [thread:$0]  (%p1519_p2), %s1150_s30, 2048, %s2406_s5, [#allocation5], %s1853_s25, %s1853_s25, %s1854_s29  }
 0x42a   : > { %1827 = dma.done.wait (%p1519_p2), [#allocation5], 2048  }
 0x42b   : > { %1829 = vsyncadd (%p1519_p2), [#allocation5], 4294965248 }
 0x42c PF: > { %p15_p8 = scmp.ge.s32.totalorder %s1907_s23, 5   ;;  %s2434_s18 = smov %s1836_s19 }
 0x42d   : > { %s2435_s19 = smov %s1840_s20  ;;  %s2436_s20 = smov %s1917_s26 }
 0x42e   : > { %s2437_s21 = smov %s1907_s23  ;;  %17 = sbr.rel (!%p15_p8) target bundleno = 4 (0x4), region = 110 }
 0x435   :  { %1165 = vsyncpa [#allocation4], 1 }
 0x436   :  { %1167 = vsyncpa [#allocation4 + $0x1], 1 }
 0x437   :  { %1168 = vsyncpa [#allocation7], 1 }
 0x438   :  { %1169 = vsyncpa [#allocation5], 1 }
 0x439   :  { %1171 = vsyncpa [#allocation5 + $0x1], 1 }

</bundles_post_ra>
